<compile_context>
chip_gen: v6e
topology: v6e:2x2x1
jax: 0.10.0
libtpu: 0.0.40
codegen_flags: <defaults>
</compile_context>

<pallas_src>
import functools

import jax
import jax.numpy as jnp
from jax.experimental import pallas as pl
from jax.experimental.pallas import tpu as pltpu


def _round_up(x, m):
    return (x + m - 1) // m * m


# ------------------- per-sequence (hoisted) encoder projection ------------------- #
def _enc_proj_kernel(enc_ref, wae_ref, ab_ref, ee_ref):
    ee = jnp.dot(enc_ref[...], wae_ref[...], preferred_element_type=jnp.float32)
    ee_ref[...] = (ee + ab_ref[...]).astype(jnp.bfloat16)


@jax.jit
def prepare_attention_inputs(encoder_output, params):
    """Per-sequence precompute: pad+cast encoder output once; hoist enc @ W_e + b (bf16)."""
    B, S, He = encoder_output.shape
    Hep, Ap = params["wae"].shape

    enc_p = jnp.pad(encoder_output, ((0, 0), (0, 0), (0, Hep - He))).astype(jnp.bfloat16)

    R = B * S
    RB = 512 if R > 512 else R            # rows per block (full-dim block for small inputs)
    Rp = _round_up(R, RB)
    enc_flat = jnp.pad(enc_p.reshape(R, Hep), ((0, Rp - R), (0, 0)))

    ee_flat = pl.pallas_call(
        _enc_proj_kernel,
        out_shape=jax.ShapeDtypeStruct((Rp, Ap), jnp.bfloat16),
        grid=(Rp // RB,),
        in_specs=[pl.BlockSpec((RB, Hep), lambda i: (i, 0)),
                  pl.BlockSpec((Hep, Ap), lambda i: (0, 0)),
                  pl.BlockSpec((1, Ap), lambda i: (0, 0))],
        out_specs=pl.BlockSpec((RB, Ap), lambda i: (i, 0)),
        compiler_params=pltpu.CompilerParams(
            dimension_semantics=("parallel",),
            vmem_limit_bytes=32 * 1024 * 1024,
        ),
    )(enc_flat, params["wae"], params["ab"])

    ee = ee_flat[:R].reshape(B, S, Ap)
    return enc_p, ee


# --------------------------- fused per-step decoder kernel ----------------------- #
def _decoder_step_kernel(lens_ref, emb_ref, h_ref, enc_ref, ee_ref,
                         wah_ref, va_ref, wce_ref, wcc_ref, bc_ref,
                         wgx_ref, wgh_ref, bg_ref, wo_ref, bo_ref,
                         logp_ref, hnew_ref, *, v_real):
    L, BT, Hp = h_ref.shape
    S = enc_ref.shape[1]
    f32 = jnp.float32
    bf16 = jnp.bfloat16

    # ---- masked additive attention (encoder projection `ee` precomputed, bf16) ----
    # NOTE: A is lane-padded 32->128; the 4x padded tanh work is accepted consciously
    # (EUP is not the binding unit at these shapes).
    h_top = h_ref[L - 1]                                                   # (BT, Hp) f32
    hh = jnp.dot(h_top.astype(bf16), wah_ref[...],
                 preferred_element_type=f32)                               # (BT, Ap)
    energy = jnp.tanh(ee_ref[...].astype(f32) + hh[:, None, :])            # (BT, S, Ap)
    score = jnp.sum(energy * va_ref[...][None, :, :], axis=-1)             # (BT, S)

    # per-row valid lengths: one vector load (no per-row scalar where-chain)
    lens_col = lens_ref[...]                                               # (BT, 1) int32
    pos = jax.lax.broadcasted_iota(jnp.int32, (BT, S), 1)
    score = jnp.where(pos < lens_col, score, -1e30)
    score = score - jnp.max(score, axis=1, keepdims=True)
    p = jnp.exp(score)                               # masked lanes underflow to exactly 0
    denom = jnp.maximum(jnp.sum(p, axis=1, keepdims=True), 1e-20)
    attn_w = p * pl.reciprocal(denom, approx=True)                         # (BT, S)

    # context = attn_w.bmm(encoder_output): VPU mul + XLU sublane reduce (not an M=1 matmul)
    context = jnp.sum(attn_w[:, :, None] * enc_ref[...].astype(f32), axis=1)  # (BT, Hep)

    # ---- attn_combine(cat(emb, context)) + ReLU, concat-free (split weight halves) ----
    x = (jnp.dot(emb_ref[...], wce_ref[...], preferred_element_type=f32)
         + jnp.dot(context.astype(bf16), wcc_ref[...], preferred_element_type=f32)
         + bc_ref[...])
    x = jnp.maximum(x, 0.0)                                                # (BT, Hp)

    # ---- L-layer GRU (seq_len == 1), concat-free fused gate matmuls per layer ----
    inp = x
    for l in range(L):                               # static, L is small
        hl = h_ref[l]                                                      # (BT, Hp) f32
        g = (jnp.dot(inp.astype(bf16), wgx_ref[l], preferred_element_type=f32)
             + jnp.dot(hl.astype(bf16), wgh_ref[l], preferred_element_type=f32)
             + bg_ref[l])                                                  # (BT, 4Hp)
        r = jax.nn.sigmoid(g[:, 0:Hp])
        z = jax.nn.sigmoid(g[:, Hp:2 * Hp])
        n = jnp.tanh(g[:, 2 * Hp:3 * Hp] + r * g[:, 3 * Hp:4 * Hp])
        hn = (1.0 - z) * n + z * hl
        hnew_ref[l] = hn
        inp = hn                                     # eval gru_dropout = identity

    # ---- output projection + LogSoftmax over the real vocab columns ----
    logits = jnp.dot(inp.astype(bf16), wo_ref[...],
                     preferred_element_type=f32) + bo_ref[...]             # (BT, Vp)
    lane = jax.lax.broadcasted_iota(jnp.int32, logits.shape, 1)
    logits = jnp.where(lane < v_real, logits, -1e30)
    m = jnp.max(logits, axis=1, keepdims=True)
    lse = jnp.log(jnp.sum(jnp.exp(logits - m), axis=1, keepdims=True)) + m
    logp_ref[...] = logits - lse


# ------------------------------------ wrapper ------------------------------------ #
@functools.partial(jax.jit, donate_argnums=(1,))
def att_bigru_decoder_step(tokens, h_p, enc_p, ee, src_lens, params):
    """One decode step. h_p stays in the padded (L, B, Hp) layout across steps."""
    B, S, Hep = enc_p.shape
    L, _, Hp = h_p.shape
    Ap = ee.shape[-1]
    V, Ep = params["embedding"].shape
    Vp = params["wo"].shape[1]

    # embedding gather hoisted to XLA (bf16 table); eval em_dropout = identity
    emb = params["embedding"][tokens.astype(jnp.int32)]                    # (B, Ep) bf16
    lens2d = src_lens.astype(jnp.int32).reshape(B, 1)

    # Batch tile: keep BT = B. Splitting a weight-streaming-bound step across TCs only
    # duplicates weight HBM traffic; split only when B/2 >= 8 and the step is compute-bound.
    BT = B
    grid = (B // BT,)

    in_specs = [
        pl.BlockSpec((BT, 1), lambda i: (i, 0)),                           # src_lens (i32)
        pl.BlockSpec((BT, Ep), lambda i: (i, 0)),                          # gathered emb (bf16)
        pl.BlockSpec((L, BT, Hp), lambda i: (0, i, 0)),                    # h (f32)
        pl.BlockSpec((BT, S, Hep), lambda i: (i, 0, 0)),                   # enc (bf16)
        pl.BlockSpec((BT, S, Ap), lambda i: (i, 0, 0)),                    # ee (bf16)
        pl.BlockSpec((Hp, Ap), lambda i: (0, 0)),                          # wah
        pl.BlockSpec((1, Ap), lambda i: (0, 0)),                           # va
        pl.BlockSpec((Ep, Hp), lambda i: (0, 0)),                          # wc (emb half)
        pl.BlockSpec((Hep, Hp), lambda i: (0, 0)),                         # wc (context half)
        pl.BlockSpec((1, Hp), lambda i: (0, 0)),                           # bc
        pl.BlockSpec((L, Hp, 4 * Hp), lambda i: (0, 0, 0)),                # wg (input half)
        pl.BlockSpec((L, Hp, 4 * Hp), lambda i: (0, 0, 0)),                # wg (hidden half)
        pl.BlockSpec((L, 1, 4 * Hp), lambda i: (0, 0, 0)),                 # bg
        pl.BlockSpec((Hp, Vp), lambda i: (0, 0)),                          # wo
        pl.BlockSpec((1, Vp), lambda i: (0, 0)),                           # bo
    ]
    out_specs = (
        pl.BlockSpec((BT, Vp), lambda i: (i, 0)),                          # log-probs
        pl.BlockSpec((L, BT, Hp), lambda i: (0, i, 0)),                    # new hidden
    )
    out_shape = (
        jax.ShapeDtypeStruct((B, Vp), jnp.float32),
        jax.ShapeDtypeStruct((L, B, Hp), jnp.float32),
    )

    # advisory cost estimate for the XLA scheduler
    flops = 2 * B * (Hp * Ap + S * Ap + S * Hep + Ep * Hp + Hep * Hp
                     + L * 2 * Hp * 4 * Hp + Hp * Vp)
    transcendentals = B * (S * Ap + S + L * 3 * Hp + Vp)
    bytes_accessed = (2 * (Hp * Ap + Ep * Hp + Hep * Hp + 2 * L * Hp * 4 * Hp + Hp * Vp)
                      + 4 * (2 * Ap + Hp + L * 4 * Hp + Vp)
                      + 2 * B * (S * (Hep + Ap) + Ep)
                      + 4 * B * (2 * L * Hp + Vp + 1))

    logp_p, h_new_p = pl.pallas_call(
        functools.partial(_decoder_step_kernel, v_real=V),
        out_shape=out_shape,
        grid=grid,
        in_specs=in_specs,
        out_specs=out_specs,
        input_output_aliases={2: 1},              # update the padded hidden state in place
        compiler_params=pltpu.CompilerParams(
            dimension_semantics=("parallel",),
            vmem_limit_bytes=32 * 1024 * 1024,
        ),
        cost_estimate=pl.CostEstimate(flops=flops, transcendentals=transcendentals,
                                      bytes_accessed=bytes_accessed),
    )(
        lens2d, emb, h_p, enc_p, ee,
        params["wah"], params["va"], params["wce"], params["wcc"], params["bc"],
        params["wgx"], params["wgh"], params["bg"], params["wo"], params["bo"],
    )
    return logp_p[:, :V], h_new_p


# -------------------------------- parameters ------------------------------------- #
def make_raw_params(key, *, V, E, He, H, A, L, pad_idx):
    ks = jax.random.split(key, 13)
    f32 = jnp.float32

    def rnd(k, shape, scale=0.1):
        return (scale * jax.random.normal(k, shape)).astype(f32)

    emb = rnd(ks[0], (V, E)).at[pad_idx].set(0.0)          # padding_idx row = 0
    return {
        "embedding": emb,
        "att_wh": rnd(ks[1], (H, A)),
        "att_we": rnd(ks[2], (He, A)),
        "att_b":  rnd(ks[3], (1, A)),
        "att_v":  rnd(ks[4], (1, A)),
        "combine_w": rnd(ks[5], (E + He, H)),
        "combine_b": rnd(ks[6], (1, H)),
        # GRU weights in "math" layout (in, 3H), gate order (r, z, n); layer-0 in == E == H
        "gru_wih": rnd(ks[7], (L, H, 3 * H)),
        "gru_whh": rnd(ks[8], (L, H, 3 * H)),
        "gru_bih": rnd(ks[9], (L, 3 * H)),
        "gru_bhh": rnd(ks[10], (L, 3 * H)),
        "out_w": rnd(ks[11], (H, V)),
        "out_b": rnd(ks[12], (1, V)),
    }


def prepare_params(raw):
    """Pad every feature dim to 128 lanes, split concat-free weight halves, fuse GRU gate
    columns as [r | z | n_input | n_hidden], cast all matmul weights (and the embedding
    table) to bf16."""
    V, E = raw["embedding"].shape
    H, A = raw["att_wh"].shape
    He = raw["att_we"].shape[0]
    L = raw["gru_wih"].shape[0]
    assert E == H, "original module wiring requires embedding_size == de_hidden_size"

    LANE = 128
    Ep, Hep, Hp, Ap, Vp = (_round_up(d, LANE) for d in (E, He, H, A, V))
    f32, bf16 = jnp.float32, jnp.bfloat16

    def pad(x, shape):
        return jnp.pad(x, [(0, t - s) for s, t in zip(x.shape, shape)])

    # attn_combine split into the embedding half and the context half (no in-kernel concat)
    wce = pad(raw["combine_w"][:E], (Ep, Hp))
    wcc = pad(raw["combine_w"][E:], (Hep, Hp))

    # GRU gate weights split into input/hidden halves, columns [r | z | n_input | n_hidden]
    wgx = jnp.zeros((L, Hp, 4 * Hp), f32)
    wgh = jnp.zeros((L, Hp, 4 * Hp), f32)
    bg = jnp.zeros((L, 1, 4 * Hp), f32)
    for l in range(L):
        wih, whh = raw["gru_wih"][l], raw["gru_whh"][l]
        bih, bhh = raw["gru_bih"][l], raw["gru_bhh"][l]
        wgx = wgx.at[l, :H, 0:H].set(wih[:, 0:H])
        wgx = wgx.at[l, :H, Hp:Hp + H].set(wih[:, H:2 * H])
        wgx = wgx.at[l, :H, 2 * Hp:2 * Hp + H].set(wih[:, 2 * H:3 * H])
        wgh = wgh.at[l, :H, 0:H].set(whh[:, 0:H])
        wgh = wgh.at[l, :H, Hp:Hp + H].set(whh[:, H:2 * H])
        wgh = wgh.at[l, :H, 3 * Hp:3 * Hp + H].set(whh[:, 2 * H:3 * H])
        bg = bg.at[l, 0, 0:H].set(bih[0:H] + bhh[0:H])
        bg = bg.at[l, 0, Hp:Hp + H].set(bih[H:2 * H] + bhh[H:2 * H])
        bg = bg.at[l, 0, 2 * Hp:2 * Hp + H].set(bih[2 * H:3 * H])
        bg = bg.at[l, 0, 3 * Hp:3 * Hp + H].set(bhh[2 * H:3 * H])

    return {
        "embedding": pad(raw["embedding"], (V, Ep)).astype(bf16),   # bf16 gather table
        "wah": pad(raw["att_wh"], (Hp, Ap)).astype(bf16),
        "wae": pad(raw["att_we"], (Hep, Ap)).astype(bf16),
        "ab":  pad(raw["att_b"], (1, Ap)).astype(f32),
        "va":  pad(raw["att_v"], (1, Ap)).astype(f32),
        "wce": wce.astype(bf16),
        "wcc": wcc.astype(bf16),
        "bc":  pad(raw["combine_b"], (1, Hp)).astype(f32),
        "wgx": wgx.astype(bf16),
        "wgh": wgh.astype(bf16),
        "bg":  bg,
        "wo":  pad(raw["out_w"], (Hp, Vp)).astype(bf16),
        "bo":  pad(raw["out_b"], (1, Vp)).astype(f32),
    }


# ------------------------------- pure-JAX reference ------------------------------- #
def reference_forward(tokens, h, encoder_output, src_lens, raw):
    B, S, He = encoder_output.shape
    L, _, H = h.shape
    emb = raw["embedding"][tokens]
    h_top = h[L - 1]
    energy = jnp.tanh((h_top @ raw["att_wh"])[:, None, :]
                      + jnp.einsum('bsh,ha->bsa', encoder_output, raw["att_we"])
                      + raw["att_b"])
    score = jnp.sum(energy * raw["att_v"], axis=-1)
    mask = jnp.arange(S)[None, :] < src_lens[:, None]
    score = jnp.where(mask, score, -1e30)
    attn_w = jax.nn.softmax(score, axis=-1)
    context = jnp.einsum('bs,bsh->bh', attn_w, encoder_output)
    x = jnp.concatenate([emb, context], axis=1) @ raw["combine_w"] + raw["combine_b"]
    x = jnp.maximum(x, 0.0)
    inp, hs = x, []
    for l in range(L):
        hl = h[l]
        gi = inp @ raw["gru_wih"][l] + raw["gru_bih"][l]
        gh = hl @ raw["gru_whh"][l] + raw["gru_bhh"][l]
        r = jax.nn.sigmoid(gi[:, :H] + gh[:, :H])
        z = jax.nn.sigmoid(gi[:, H:2 * H] + gh[:, H:2 * H])
        n = jnp.tanh(gi[:, 2 * H:] + r * gh[:, 2 * H:])
        hn = (1.0 - z) * n + z * hl
        hs.append(hn)
        inp = hn
    logits = inp @ raw["out_w"] + raw["out_b"]
    return jax.nn.log_softmax(logits, axis=1), jnp.stack(hs, axis=0)


# ------------------------------------- main --------------------------------------- #
if __name__ == "__main__":
    # config (embedding_size == de_hidden_size, required by the original wiring)
    B, S = 2, 8
    V, E, He, H, A, L = 64, 32, 48, 32, 32, 2
    pad_idx = 0

    key = jax.random.PRNGKey(0)
    k_tok, k_h, k_enc, k_par = jax.random.split(key, 4)

    tokens = jax.random.randint(k_tok, (B,), 0, V, dtype=jnp.int32)
    h0 = (0.1 * jax.random.normal(k_h, (L, B, H))).astype(jnp.float32)
    enc = (0.1 * jax.random.normal(k_enc, (B, S, He))).astype(jnp.float32)
    src_lens = jnp.array([S, 5], dtype=jnp.int32)

    raw = make_raw_params(k_par, V=V, E=E, He=He, H=H, A=A, L=L, pad_idx=pad_idx)
    params = prepare_params(raw)

    # per-sequence precompute (hoisted out of the decode loop)
    enc_p, ee = prepare_attention_inputs(enc, params)

    # hidden state lives in the padded (L, B, Hp) layout across the whole decode loop
    Hp = params["wo"].shape[0]
    h_p = jnp.pad(h0, ((0, 0), (0, 0), (0, Hp - H)))

    logp, h_new_p = att_bigru_decoder_step(tokens, h_p, enc_p, ee, src_lens, params)
    jax.block_until_ready((logp, h_new_p))
    h_new = h_new_p[:, :, :H]

    ref_logp, ref_h = reference_forward(tokens, h0, enc, src_lens, raw)

    assert logp.shape == (B, V) and h_new.shape == (L, B, H)
    assert bool(jnp.all(jnp.isfinite(logp))) and bool(jnp.all(jnp.isfinite(h_new)))
    assert bool(jnp.allclose(jnp.sum(jnp.exp(logp), axis=1), 1.0, atol=1e-4))
    # bf16 matmuls / bf16 ee / approx reciprocal vs f32 reference
    assert bool(jnp.allclose(logp, ref_logp, atol=2e-2, rtol=0.0))
    assert bool(jnp.allclose(h_new, ref_h, atol=2e-2, rtol=0.0))

    print("KERNEL_OK")
</pallas_src>

<mosaic_0001>
module attributes {stable_mosaic.version = 11 : i64} {
  func.func @_enc_proj_kernel(%arg0: i32, %arg1: memref<16x128xbf16, #tpu.memory_space<vmem>>, %arg2: memref<128x128xbf16, #tpu.memory_space<vmem>>, %arg3: memref<1x128xf32, #tpu.memory_space<vmem>>, %arg4: memref<16x128xbf16, #tpu.memory_space<vmem>>) attributes {dimension_semantics = [#tpu.dimension_semantics<parallel>], iteration_bounds = array<i64: 1>, scalar_prefetch = 0 : i64, scratch_operands = 0 : i64, tpu.core_type = #tpu.core_type<tc>, window_params = [{transform_indices = @transform_0, window_bounds = array<i64: 16, 128>}, {pipeline_mode = #tpu.pipeline_mode<synchronous>, transform_indices = @transform_1, window_bounds = array<i64: 128, 128>}, {pipeline_mode = #tpu.pipeline_mode<synchronous>, transform_indices = @transform_2, window_bounds = array<i64: 1, 128>}, {transform_indices = @transform_3, window_bounds = array<i64: 16, 128>}]} {
    %c0 = arith.constant 0 : index
    %c0_0 = arith.constant 0 : index
    %0 = vector.load %arg1[%c0, %c0_0] : memref<16x128xbf16, #tpu.memory_space<vmem>>, vector<16x128xbf16>
    %c0_1 = arith.constant 0 : index
    %c0_2 = arith.constant 0 : index
    %1 = vector.load %arg2[%c0_1, %c0_2] : memref<128x128xbf16, #tpu.memory_space<vmem>>, vector<128x128xbf16>
    %cst = arith.constant dense<0.000000e+00> : vector<16x128xf32>
    %2 = tpu.matmul %0, %1, %cst {dimension_numbers = #tpu.dot_dimension_numbers<[1], [0], [0], [1], [0, 0, 1, 1], [], []>} : vector<16x128xbf16>, vector<128x128xbf16>, vector<16x128xf32> -> vector<16x128xf32>
    %c0_3 = arith.constant 0 : index
    %c0_4 = arith.constant 0 : index
    %3 = vector.load %arg3[%c0_3, %c0_4] : memref<1x128xf32, #tpu.memory_space<vmem>>, vector<1x128xf32>
    %4 = vector.broadcast %3 : vector<1x128xf32> to vector<16x128xf32>
    %5 = arith.addf %2, %4 : vector<16x128xf32>
    %6 = arith.truncf %5 : vector<16x128xf32> to vector<16x128xbf16>
    %c0_5 = arith.constant 0 : index
    %c0_6 = arith.constant 0 : index
    %7 = vector.load %arg4[%c0_5, %c0_6] : memref<16x128xbf16, #tpu.memory_space<vmem>>, vector<16x128xbf16>
    tpu.vector_store %arg4[%c0_5, %c0_6], %6 {strides = array<i32>} : memref<16x128xbf16, #tpu.memory_space<vmem>>, vector<16x128xbf16>,
    return
  }
  func.func @transform_0(%arg0: i32) -> (i32, i32) {
    %c0_i32 = arith.constant 0 : i32
    %c0_i32_0 = arith.constant 0 : i32
    return %arg0, %c0_i32 : i32, i32
  }
  func.func @transform_1(%arg0: i32) -> (i32, i32) {
    %c0_i32 = arith.constant 0 : i32
    %c0_i32_0 = arith.constant 0 : i32
    %c0_i32_1 = arith.constant 0 : i32
    return %c0_i32, %c0_i32_0 : i32, i32
  }
  func.func @transform_2(%arg0: i32) -> (i32, i32) {
    %c0_i32 = arith.constant 0 : i32
    %c0_i32_0 = arith.constant 0 : i32
    %c0_i32_1 = arith.constant 0 : i32
    return %c0_i32, %c0_i32_0 : i32, i32
  }
  func.func @transform_3(%arg0: i32) -> (i32, i32) {
    %c0_i32 = arith.constant 0 : i32
    %c0_i32_0 = arith.constant 0 : i32
    return %arg0, %c0_i32 : i32, i32
  }
}

</mosaic_0001>

<bundles_post_ra>
// kernel: prepare_attention_inputs.1
= control target key start
LH: loop header
LB: loop body
LE: loop exit
PB: predicated region body
PF: predicated region fallthrough
CT: control target
= control target key end

     0   :  { %8 = vsyncpa [#allocation3], 0  ;;  %s328_s0 = inlined_call_operand.vmem [shape: bf16[16,128], index: 0, kind: input, shape index: {}]   ;;  %s329_s1 = inlined_call_operand.hbm [shape: bf16[128,128], index: 1, kind: input, shape index: {}]   ;;  %s330_s2 = inlined_call_operand.vmem [shape: f32[1,128], index: 2, kind: input, shape index: {}]   ;;  %s331_s3 = inlined_call_operand.hbm [shape: bf16[16,128], index: 3, kind: output, shape index: {}]  }
   0x1   :  { %9 = vsyncpa [#allocation4], 0  ;;  %s284_s12 = smov [#allocation2]  }
   0x2   :  { %s17_s13 = sshll.u32 %s284_s12, 4  ;;  %s18_s13 = int_to_ptr.vmem [resolvable:$true] %s17_s13 }
   0x3   :  { %s248_s14 = scalar_lea.vmem %s18_s13, 1024  ;;  %p253_p1 = scmp.lt.s32.totalorder %s18_s13, %s18_s13 }
   0x4   :  { %p249_p0 = scmp.ne.s32.totalorder %s18_s13, %s248_s14  ;;  %p254_p2 = scmp.lt.s32.totalorder %s248_s14, %s248_s14 }
   0x6   :  { %p255_p3 = por %p254_p2, %p253_p1 }
   0x8   :  { %p256_p4 = pnand %p255_p3, %p249_p0 }
   0xa   :  { %259 = shalt.err (!%p256_p4)
}
   0xb   :  { %s285_s15 = smov 64   ;;  %s286_s16 = smov 4  }
   0xc   :  { %23 = dma.hbm_to_vmem [thread:$0]  %s329_s1, 1024, %s18_s13, [#allocation3], %s285_s15, %s285_s15, %s286_s16  }
   0xd   :  { %280 = dma.done.wait [#allocation3], 1024  }
   0xe   :  { %281 = vsyncadd [#allocation3], 4294966272  ;;  %v287_v0 = vmov 0.0   ;;  %vm288_vm0 = vmmov 0   ;;  %v231_v1 = vld [vmem:[#allocation2 + $0x38] sm:$0xff]   ;;  %v232_v2 = vld [vmem:[#allocation2 + $0x30] sm:$0xff]  }
   0xf   :  { %205 = vmatprep.subr.bf16.mxu0 %v287_v0  ;;  %221 = vmatprep.mubr.msk.bf16.mxu0 %vm288_vm0, %v287_v0  ;;  %v233_v3 = vld [vmem:[#allocation2 + $0x28] sm:$0xff]   ;;  %v234_v4 = vld [vmem:[#allocation2 + $0x20] sm:$0xff]   ;;  %v235_v5 = vld [vmem:[#allocation2 + $0x18] sm:$0xff]   ;;  %s289_s22 = smov [#allocation5]  }
  0x10   :  { %206 = vmatpush3.bf16.msra.mxu0 %v231_v1  ;;  %v236_v6 = vld [vmem:[#allocation2 + $0x10] sm:$0xff]   ;;  %v237_v7 = vld [vmem:[#allocation2 + $0x8] sm:$0xff]   ;;  %v238_v8 = vld [vmem:[#allocation2] sm:$0xff]   ;;  %s165_s23 = sshll.u32 %s289_s22, 4  ;;  %s166_s23 = int_to_ptr.vmem [resolvable:$true] %s165_s23 }
  0x11   :  { %207 = vmatprep.subr.bf16.mxu0 %v287_v0  ;;  %v239_v9 = vld [vmem:[%s328_s0] sm:$0xff]   ;;  %s260_s24 = scalar_lea.vmem %s166_s23, 128  ;;  %p265_p6 = scmp.lt.s32.totalorder %s166_s23, %s166_s23 }
  0x12   :  { %v177_v11 = vld [vmem:[%s330_s2] ss:$0 sm:$0xff]  ;;  %p261_p5 = scmp.ne.s32.totalorder %s166_s23, %s260_s24  ;;  %p266_p7 = scmp.lt.s32.totalorder %s260_s24, %s260_s24 }
  0x14   :  { %208 = vmatpush3.bf16.msra.mxu0 %v232_v2  ;;  %p267_p8 = por %p266_p7, %p265_p6 }
  0x15   :  { %209 = vmatprep.subr.bf16.mxu0 %v287_v0 }
  0x16   :  { %p268_p9 = pnand %p267_p8, %p261_p5 }
  0x18   :  { %210 = vmatpush3.bf16.msra.mxu0 %v233_v3 }
  0x19   :  { %211 = vmatprep.subr.bf16.mxu0 %v287_v0 }
  0x1c   :  { %212 = vmatpush3.bf16.msra.mxu0 %v234_v4 }
  0x1d   :  { %213 = vmatprep.subr.bf16.mxu0 %v287_v0 }
  0x20   :  { %214 = vmatpush3.bf16.msra.mxu0 %v235_v5 }
  0x21   :  { %215 = vmatprep.subr.bf16.mxu0 %v287_v0 }
  0x24   :  { %216 = vmatpush3.bf16.msra.mxu0 %v236_v6 }
  0x25   :  { %217 = vmatprep.subr.bf16.mxu0 %v287_v0 }
  0x28   :  { %218 = vmatpush3.bf16.msra.mxu0 %v237_v7 }
  0x29   :  { %219 = vmatprep.subr.bf16.mxu0 %v287_v0 }
  0x2c   :  { %220 = vmatpush3.bf16.msra.mxu0 %v238_v8 }
  0x2f   :  { %222 = vmatmul.mubr.bf16.vlgmr.msra.gmra.mxu0 %v239_v9 }
  0xef   :  { %v143_v10 = vpop.f32.mrf.mxu0 }
  0xf0   :  { %v144_v14 = vadd.f32 %v177_v11, %v143_v10 }
  0xf1   :  { %v223_v12 = vpop.f32.mrf.mxu0 }
  0xf3   :  { %v146_v13 = vpop.f32.mrf.mxu0 }
  0xf4   :  { %v147_v15 = vadd.f32 %v177_v11, %v146_v13 }
  0xf5   :  { %v224_v16 = vpop.f32.mrf.mxu0 }
  0xf6   :  { %v194_v17 = vpack.c.bf16 %v147_v15, %v144_v14 }
  0xf8   :  { %195 = vst [vmem:[#allocation5] sm:$0xff] %v194_v17  }
  0xf9   :  { %271 = shalt.err (!%p268_p9)
}
  0xfa   :  { %171 = dma.vmem_to_hbm [thread:$0]  %s166_s23, 128, %s331_s3, [#allocation4], %s285_s15, %s285_s15, %s286_s16  }
  0xfb   :  { %282 = dma.done.wait [#allocation4], 128  }
  0xfc   :  { %283 = vsyncadd [#allocation4], 4294967168 }
  0xfd   :  { %175 = vsyncpa [#allocation3], 1 }
  0xfe   :  { %176 = vsyncpa [#allocation4], 1 }

</bundles_post_ra>
